<compile_context>
chip_gen: v5e
topology: v5e:2x2
jax: 0.10.0
libtpu: 0.0.40
codegen_flags: <defaults>
</compile_context>

<pallas_src>
import functools

import jax
import jax.numpy as jnp
from jax.experimental import pallas as pl
from jax.experimental.pallas import tpu as pltpu


def _round_up(v, m):
    return (v + m - 1) // m * m


def _mlp_kernel(x_ref, w1_ref, b1_ref, wh_ref, bh_ref, w2_ref, b2_ref, o_ref,
                *, num_hidden_layers, compute_dtype):
    # fc1: (Hp, Fp) @ (Fp, tb) -> (Hp, tb), f32 accumulation on the MXU.
    h = jnp.dot(w1_ref[...], x_ref[...], preferred_element_type=jnp.float32)
    h = jnp.maximum(h + b1_ref[...], 0.0)            # bias + ReLU in f32 (VPU)

    # MLPBase: `layers` x (Linear(H, H) + ReLU).  Static unroll (tiny count).
    for l in range(num_hidden_layers):
        h = jnp.dot(wh_ref[l], h.astype(compute_dtype),
                    preferred_element_type=jnp.float32)
        h = jnp.maximum(h + bh_ref[l], 0.0)

    # fc2: (1, Hp) @ (Hp, tb) -> (1, tb) lane-dense output slab.
    out = jnp.dot(w2_ref[...], h.astype(compute_dtype),
                  preferred_element_type=jnp.float32)
    o_ref[...] = out + b2_ref[...]


@functools.partial(jax.jit,
                   static_argnames=("num_hidden_layers", "batch_tile",
                                    "compute_dtype"))
def conv2d_mlp_forward(x, params, *, num_hidden_layers, batch_tile=4096,
                       compute_dtype=jnp.bfloat16):
    """Full Conv2DMLP forward in one pallas_call.

    x: (B, F) float32, F = 12 (len(features) + 4)
    params (PyTorch nn.Linear layout, (out, in) weights):
      w1 (H, F), b1 (H,), wh (L, H, H), bh (L, H), w2 (1, H), b2 (1,)
    Returns (B, 1) float32.
    """
    w1, b1, wh, bh, w2, b2 = (params["w1"], params["b1"], params["wh"],
                              params["bh"], params["w2"], params["b2"])
    B, F = x.shape
    H = w1.shape[0]
    L = wh.shape[0]
    assert L == num_hidden_layers
    assert w1.shape == (H, F) and w2.shape == (1, H)
    assert batch_tile % 128 == 0

    cd = compute_dtype
    Hp = _round_up(H, 128)          # hidden width -> full MXU tile (exact pad)
    Fp = _round_up(F, 8)            # input features -> sublane multiple

    # Zero-padded, feature-major parameters (weights bf16, biases f32).
    w1p = jnp.zeros((Hp, Fp), cd).at[:H, :F].set(w1.astype(cd))
    b1p = jnp.zeros((Hp, 1), jnp.float32).at[:H, 0].set(b1.astype(jnp.float32))
    Lp = max(L, 1)                  # keep arrays non-empty even if L == 0
    whp = jnp.zeros((Lp, Hp, Hp), cd).at[:L, :H, :H].set(wh.astype(cd))
    bhp = jnp.zeros((Lp, Hp, 1), jnp.float32).at[:L, :H, 0].set(
        bh.astype(jnp.float32))
    w2p = jnp.zeros((1, Hp), cd).at[:, :H].set(w2.astype(cd))
    b2p = jnp.asarray(b2, jnp.float32).reshape(1, 1)

    # Batch rides the lane axis: pad B up to a multiple of the batch tile.
    Bp = _round_up(B, 128)
    tb = min(batch_tile, Bp)
    if Bp % tb:
        Bp = _round_up(Bp, tb)
    xT = jnp.zeros((Fp, Bp), cd).at[:F, :B].set(x.T.astype(cd))

    kernel = functools.partial(_mlp_kernel, num_hidden_layers=L,
                               compute_dtype=cd)

    def _full(a):
        n = a.ndim
        return pl.BlockSpec(a.shape, lambda i, _n=n: (0,) * _n)

    out_T = pl.pallas_call(
        kernel,
        out_shape=jax.ShapeDtypeStruct((1, Bp), jnp.float32),
        grid_spec=pltpu.PrefetchScalarGridSpec(
            num_scalar_prefetch=0,
            grid=(Bp // tb,),
            in_specs=[
                pl.BlockSpec((Fp, tb), lambda i: (0, i)),   # x (feature-major)
                _full(w1p),                                 # fc1 weight
                _full(b1p),                                 # fc1 bias
                _full(whp),                                 # hidden weights
                _full(bhp),                                 # hidden biases
                _full(w2p),                                 # fc2 weight
                _full(b2p),                                 # fc2 bias
            ],
            out_specs=pl.BlockSpec((1, tb), lambda i: (0, i)),
        ),
        compiler_params=pltpu.CompilerParams(
            dimension_semantics=("parallel",),
            vmem_limit_bytes=32 * 1024 * 1024),
    )(xT, w1p, b1p, whp, bhp, w2p, b2p)

    return out_T[:, :B].T           # (B, 1) float32


def init_params(key, *, in_features, layer_size, num_hidden_layers):
    """Deterministic synthetic parameters in PyTorch nn.Linear layout."""
    ks = jax.random.split(key, 6)
    scale = 0.1
    w1 = scale * jax.random.normal(ks[0], (layer_size, in_features), jnp.float32)
    b1 = scale * jax.random.normal(ks[1], (layer_size,), jnp.float32)
    wh = scale * jax.random.normal(
        ks[2], (num_hidden_layers, layer_size, layer_size), jnp.float32)
    bh = scale * jax.random.normal(
        ks[3], (num_hidden_layers, layer_size), jnp.float32)
    w2 = scale * jax.random.normal(ks[4], (1, layer_size), jnp.float32)
    b2 = scale * jax.random.normal(ks[5], (1,), jnp.float32)
    return dict(w1=w1, b1=b1, wh=wh, bh=bh, w2=w2, b2=b2)


def reference_forward(x, params, *, num_hidden_layers,
                      compute_dtype=jnp.bfloat16):
    """Pure-JAX reference matching the PyTorch module (same bf16 casts)."""
    cd = compute_dtype

    def dense(h, w, b):
        y = jnp.dot(h.astype(cd), w.astype(cd).T,
                    preferred_element_type=jnp.float32)
        return y + b.astype(jnp.float32)

    h = jnp.maximum(dense(x, params["w1"], params["b1"]), 0.0)
    for l in range(num_hidden_layers):
        h = jnp.maximum(dense(h, params["wh"][l], params["bh"][l]), 0.0)
    return dense(h, params["w2"], params["b2"])


if __name__ == "__main__":
    # Conv2DMLP(layers=3, layer_size=32); in_features = len(features) + 4 = 12.
    LAYERS = 3
    LAYER_SIZE = 32
    IN_FEATURES = 12
    BATCH = 8

    key = jax.random.PRNGKey(0)
    k_x, k_p = jax.random.split(key)
    x = jax.random.normal(k_x, (BATCH, IN_FEATURES), jnp.float32)
    params = init_params(k_p, in_features=IN_FEATURES,
                         layer_size=LAYER_SIZE, num_hidden_layers=LAYERS)

    out = conv2d_mlp_forward(x, params, num_hidden_layers=LAYERS)
    out = jax.block_until_ready(out)

    ref = reference_forward(x, params, num_hidden_layers=LAYERS)
    assert out.shape == (BATCH, 1)
    assert jnp.allclose(out, ref, atol=5e-3, rtol=5e-2), "mismatch vs reference"

    print("KERNEL_OK")
</pallas_src>

<mosaic_0001>
module attributes {stable_mosaic.version = 11 : i64} {
  func.func @_mlp_kernel(%arg0: i32, %arg1: memref<16x128xbf16, #tpu.memory_space<vmem>>, %arg2: memref<128x16xbf16, #tpu.memory_space<vmem>>, %arg3: memref<128x1xf32, #tpu.memory_space<vmem>>, %arg4: memref<3x128x128xbf16, #tpu.memory_space<vmem>>, %arg5: memref<3x128x1xf32, #tpu.memory_space<vmem>>, %arg6: memref<1x128xbf16, #tpu.memory_space<vmem>>, %arg7: memref<1x1xf32, #tpu.memory_space<vmem>>, %arg8: memref<1x128xf32, #tpu.memory_space<vmem>>) attributes {dimension_semantics = [#tpu.dimension_semantics<parallel>], iteration_bounds = array<i64: 1>, scalar_prefetch = 0 : i64, scratch_operands = 0 : i64, tpu.core_type = #tpu.core_type<tc>, window_params = [{transform_indices = @transform_0, window_bounds = array<i64: 16, 128>}, {pipeline_mode = #tpu.pipeline_mode<synchronous>, transform_indices = @transform_1, window_bounds = array<i64: 128, 16>}, {pipeline_mode = #tpu.pipeline_mode<synchronous>, transform_indices = @transform_2, window_bounds = array<i64: 128, 1>}, {pipeline_mode = #tpu.pipeline_mode<synchronous>, transform_indices = @transform_3, window_bounds = array<i64: 3, 128, 128>}, {pipeline_mode = #tpu.pipeline_mode<synchronous>, transform_indices = @transform_4, window_bounds = array<i64: 3, 128, 1>}, {pipeline_mode = #tpu.pipeline_mode<synchronous>, transform_indices = @transform_5, window_bounds = array<i64: 1, 128>}, {pipeline_mode = #tpu.pipeline_mode<synchronous>, transform_indices = @transform_6, window_bounds = array<i64: 1, 1>}, {transform_indices = @transform_7, window_bounds = array<i64: 1, 128>}]} {
    %c0 = arith.constant 0 : index
    %c0_0 = arith.constant 0 : index
    %0 = vector.load %arg2[%c0, %c0_0] : memref<128x16xbf16, #tpu.memory_space<vmem>>, vector<128x16xbf16>
    %c0_1 = arith.constant 0 : index
    %c0_2 = arith.constant 0 : index
    %1 = vector.load %arg1[%c0_1, %c0_2] : memref<16x128xbf16, #tpu.memory_space<vmem>>, vector<16x128xbf16>
    %cst = arith.constant dense<0.000000e+00> : vector<128x128xf32>
    %2 = tpu.matmul %0, %1, %cst {dimension_numbers = #tpu.dot_dimension_numbers<[1], [0], [0], [1], [0, 0, 1, 1], [], []>} : vector<128x16xbf16>, vector<16x128xbf16>, vector<128x128xf32> -> vector<128x128xf32>
    %c0_3 = arith.constant 0 : index
    %c0_4 = arith.constant 0 : index
    %3 = vector.load %arg3[%c0_3, %c0_4] : memref<128x1xf32, #tpu.memory_space<vmem>>, vector<128x1xf32>
    %4 = vector.broadcast %3 : vector<128x1xf32> to vector<128x128xf32>
    %5 = arith.addf %2, %4 : vector<128x128xf32>
    %cst_5 = arith.constant 0.000000e+00 : f32
    %6 = vector.broadcast %cst_5 : f32 to vector<128x128xf32>
    %7 = arith.maximumf %5, %6 : vector<128x128xf32>
    %c0_6 = arith.constant 0 : index
    %c0_7 = arith.constant 0 : index
    %c0_8 = arith.constant 0 : index
    %8 = vector.load %arg4[%c0_6, %c0_7, %c0_8] : memref<3x128x128xbf16, #tpu.memory_space<vmem>>, vector<1x128x128xbf16>
    %9 = vector.shape_cast %8 : vector<1x128x128xbf16> to vector<128x128xbf16>
    %10 = arith.truncf %7 : vector<128x128xf32> to vector<128x128xbf16>
    %cst_9 = arith.constant dense<0.000000e+00> : vector<128x128xf32>
    %11 = tpu.matmul %9, %10, %cst_9 {dimension_numbers = #tpu.dot_dimension_numbers<[1], [0], [0], [1], [0, 0, 1, 1], [], []>} : vector<128x128xbf16>, vector<128x128xbf16>, vector<128x128xf32> -> vector<128x128xf32>
    %c0_10 = arith.constant 0 : index
    %c0_11 = arith.constant 0 : index
    %c0_12 = arith.constant 0 : index
    %12 = vector.load %arg5[%c0_10, %c0_11, %c0_12] : memref<3x128x1xf32, #tpu.memory_space<vmem>>, vector<1x128x1xf32>
    %13 = vector.shape_cast %12 : vector<1x128x1xf32> to vector<128x1xf32>
    %14 = vector.broadcast %13 : vector<128x1xf32> to vector<128x128xf32>
    %15 = arith.addf %11, %14 : vector<128x128xf32>
    %cst_13 = arith.constant 0.000000e+00 : f32
    %16 = vector.broadcast %cst_13 : f32 to vector<128x128xf32>
    %17 = arith.maximumf %15, %16 : vector<128x128xf32>
    %c1 = arith.constant 1 : index
    %c0_14 = arith.constant 0 : index
    %c0_15 = arith.constant 0 : index
    %18 = vector.load %arg4[%c1, %c0_14, %c0_15] : memref<3x128x128xbf16, #tpu.memory_space<vmem>>, vector<1x128x128xbf16>
    %19 = vector.shape_cast %18 : vector<1x128x128xbf16> to vector<128x128xbf16>
    %20 = arith.truncf %17 : vector<128x128xf32> to vector<128x128xbf16>
    %cst_16 = arith.constant dense<0.000000e+00> : vector<128x128xf32>
    %21 = tpu.matmul %19, %20, %cst_16 {dimension_numbers = #tpu.dot_dimension_numbers<[1], [0], [0], [1], [0, 0, 1, 1], [], []>} : vector<128x128xbf16>, vector<128x128xbf16>, vector<128x128xf32> -> vector<128x128xf32>
    %c1_17 = arith.constant 1 : index
    %c0_18 = arith.constant 0 : index
    %c0_19 = arith.constant 0 : index
    %22 = vector.load %arg5[%c1_17, %c0_18, %c0_19] : memref<3x128x1xf32, #tpu.memory_space<vmem>>, vector<1x128x1xf32>
    %23 = vector.shape_cast %22 : vector<1x128x1xf32> to vector<128x1xf32>
    %24 = vector.broadcast %23 : vector<128x1xf32> to vector<128x128xf32>
    %25 = arith.addf %21, %24 : vector<128x128xf32>
    %cst_20 = arith.constant 0.000000e+00 : f32
    %26 = vector.broadcast %cst_20 : f32 to vector<128x128xf32>
    %27 = arith.maximumf %25, %26 : vector<128x128xf32>
    %c2 = arith.constant 2 : index
    %c0_21 = arith.constant 0 : index
    %c0_22 = arith.constant 0 : index
    %28 = vector.load %arg4[%c2, %c0_21, %c0_22] : memref<3x128x128xbf16, #tpu.memory_space<vmem>>, vector<1x128x128xbf16>
    %29 = vector.shape_cast %28 : vector<1x128x128xbf16> to vector<128x128xbf16>
    %30 = arith.truncf %27 : vector<128x128xf32> to vector<128x128xbf16>
    %cst_23 = arith.constant dense<0.000000e+00> : vector<128x128xf32>
    %31 = tpu.matmul %29, %30, %cst_23 {dimension_numbers = #tpu.dot_dimension_numbers<[1], [0], [0], [1], [0, 0, 1, 1], [], []>} : vector<128x128xbf16>, vector<128x128xbf16>, vector<128x128xf32> -> vector<128x128xf32>
    %c2_24 = arith.constant 2 : index
    %c0_25 = arith.constant 0 : index
    %c0_26 = arith.constant 0 : index
    %32 = vector.load %arg5[%c2_24, %c0_25, %c0_26] : memref<3x128x1xf32, #tpu.memory_space<vmem>>, vector<1x128x1xf32>
    %33 = vector.shape_cast %32 : vector<1x128x1xf32> to vector<128x1xf32>
    %34 = vector.broadcast %33 : vector<128x1xf32> to vector<128x128xf32>
    %35 = arith.addf %31, %34 : vector<128x128xf32>
    %cst_27 = arith.constant 0.000000e+00 : f32
    %36 = vector.broadcast %cst_27 : f32 to vector<128x128xf32>
    %37 = arith.maximumf %35, %36 : vector<128x128xf32>
    %c0_28 = arith.constant 0 : index
    %c0_29 = arith.constant 0 : index
    %38 = vector.load %arg6[%c0_28, %c0_29] : memref<1x128xbf16, #tpu.memory_space<vmem>>, vector<1x128xbf16>
    %39 = arith.truncf %37 : vector<128x128xf32> to vector<128x128xbf16>
    %cst_30 = arith.constant dense<0.000000e+00> : vector<1x128xf32>
    %40 = tpu.matmul %38, %39, %cst_30 {dimension_numbers = #tpu.dot_dimension_numbers<[1], [0], [0], [1], [0, 0, 1, 1], [], []>} : vector<1x128xbf16>, vector<128x128xbf16>, vector<1x128xf32> -> vector<1x128xf32>
    %c0_31 = arith.constant 0 : index
    %c0_32 = arith.constant 0 : index
    %41 = vector.load %arg7[%c0_31, %c0_32] : memref<1x1xf32, #tpu.memory_space<vmem>>, vector<1x1xf32>
    %42 = vector.broadcast %41 : vector<1x1xf32> to vector<1x128xf32>
    %43 = arith.addf %40, %42 : vector<1x128xf32>
    %c0_33 = arith.constant 0 : index
    %c0_34 = arith.constant 0 : index
    %44 = vector.load %arg8[%c0_33, %c0_34] : memref<1x128xf32, #tpu.memory_space<vmem>>, vector<1x128xf32>
    tpu.vector_store %arg8[%c0_33, %c0_34], %43 {strides = array<i32>} : memref<1x128xf32, #tpu.memory_space<vmem>>, vector<1x128xf32>,
    return
  }
  func.func @transform_0(%arg0: i32) -> (i32, i32) {
    %c0_i32 = arith.constant 0 : i32
    %c0_i32_0 = arith.constant 0 : i32
    return %c0_i32, %arg0 : i32, i32
  }
  func.func @transform_1(%arg0: i32) -> (i32, i32) {
    %c0_i32 = arith.constant 0 : i32
    %c0_i32_0 = arith.constant 0 : i32
    %c0_i32_1 = arith.constant 0 : i32
    return %c0_i32, %c0_i32_0 : i32, i32
  }
  func.func @transform_2(%arg0: i32) -> (i32, i32) {
    %c0_i32 = arith.constant 0 : i32
    %c0_i32_0 = arith.constant 0 : i32
    %c0_i32_1 = arith.constant 0 : i32
    return %c0_i32, %c0_i32_0 : i32, i32
  }
  func.func @transform_3(%arg0: i32) -> (i32, i32, i32) {
    %c0_i32 = arith.constant 0 : i32
    %c0_i32_0 = arith.constant 0 : i32
    %c0_i32_1 = arith.constant 0 : i32
    %c0_i32_2 = arith.constant 0 : i32
    return %c0_i32, %c0_i32_0, %c0_i32_1 : i32, i32, i32
  }
  func.func @transform_4(%arg0: i32) -> (i32, i32, i32) {
    %c0_i32 = arith.constant 0 : i32
    %c0_i32_0 = arith.constant 0 : i32
    %c0_i32_1 = arith.constant 0 : i32
    %c0_i32_2 = arith.constant 0 : i32
    return %c0_i32, %c0_i32_0, %c0_i32_1 : i32, i32, i32
  }
  func.func @transform_5(%arg0: i32) -> (i32, i32) {
    %c0_i32 = arith.constant 0 : i32
    %c0_i32_0 = arith.constant 0 : i32
    %c0_i32_1 = arith.constant 0 : i32
    return %c0_i32, %c0_i32_0 : i32, i32
  }
  func.func @transform_6(%arg0: i32) -> (i32, i32) {
    %c0_i32 = arith.constant 0 : i32
    %c0_i32_0 = arith.constant 0 : i32
    %c0_i32_1 = arith.constant 0 : i32
    return %c0_i32, %c0_i32_0 : i32, i32
  }
  func.func @transform_7(%arg0: i32) -> (i32, i32) {
    %c0_i32 = arith.constant 0 : i32
    %c0_i32_0 = arith.constant 0 : i32
    return %c0_i32, %arg0 : i32, i32
  }
}

</mosaic_0001>

<bundles_post_ra>
// kernel: conv2d_mlp_forward.1
= control target key start
LH: loop header
LB: loop body
LE: loop exit
PB: predicated region body
PF: predicated region fallthrough
CT: control target
= control target key end

     0   :  { %v1257_v0 = vmov 0   ;;  %vm189_vm0 = vcmask 130048   ;;  %s1639_s2 = inlined_call_operand.vmem [shape: f32[128,1], index: 2, kind: input, shape index: {}]   ;;  %s1640_s0 = inlined_call_operand.vmem [shape: bf16[16,128], index: 0, kind: input, shape index: {}]   ;;  %s1641_s1 = inlined_call_operand.vmem [shape: bf16[128,16], index: 1, kind: input, shape index: {}]   ;;  %s1642_s4 = inlined_call_operand.vmem [shape: f32[3,128,1], index: 4, kind: input, shape index: {}]   ;;  %s1643_s6 = inlined_call_operand.<no memory space> [shape: f32[1,1], index: 6, kind: input, shape index: {}]   ;;  %s1644_s3 = inlined_call_operand.vmem [shape: bf16[3,128,128], index: 3, kind: input, shape index: {}]   ;;  %s1645_s5 = inlined_call_operand.vmem [shape: bf16[1,128], index: 5, kind: input, shape index: {}]   ;;  %s1646_s7 = inlined_call_operand.vmem [shape: f32[1,128], index: 7, kind: output, shape index: {}]  }
   0x1   :  { %1256 = vset.pattern.permute.xlu2 %v1257_v0  ;;  %1255 = vset.pattern.permute.xlu1 %v1257_v0  ;;  %v61_v1 = vld [vmem:[%s1639_s2 + $0x70] sm:$0xff]  ;;  %v59_v2 = vld [vmem:[%s1639_s2 + $0x60] sm:$0xff]  ;;  %v60_v6 = vld [vmem:[%s1639_s2 + $0x68] sm:$0xff] }
   0x2   :  { %v57_v3 = vld [vmem:[%s1639_s2 + $0x50] sm:$0xff]  ;;  %1254 = vset.pattern.permute.xlu0 %v1257_v0  ;;  %125 = vperm.xlu1 %1255, %v59_v2   ;;  %v1228_v4 = vld [vmem:[%s1640_s0] sm:$0xff]  ;;  %v62_v7 = vld [vmem:[%s1639_s2 + $0x78] sm:$0xff] }
   0x3   :  { %135 = vperm.xlu0 %1254, %v61_v1   ;;  %115 = vperm.xlu2 %1256, %v57_v3   ;;  %v1220_v5 = vld [vmem:[%s1641_s1] sm:$0xff]  ;;  %v58_v8 = vld [vmem:[%s1639_s2 + $0x58] sm:$0xff]  ;;  %v56_v9 = vld [vmem:[%s1639_s2 + $0x48] sm:$0xff]  ;;  %v12_v3 = vstv %s1643_s6 }
   0x4   :  { %221 = vmatpush.bf16.msra.mxu0 %v1228_v4  ;;  %v55_v10 = vld [vmem:[%s1639_s2 + $0x40] sm:$0xff]  ;;  %v53_v11 = vld [vmem:[%s1639_s2 + $0x30] sm:$0xff]  ;;  %v1221_v12 = vld [vmem:[%s1641_s1 + $0x8] sm:$0xff]  ;;  %13 = vst [vmem:[#allocation2] sm:$0x1] %v12_v3 }
   0x5   :  { %v51_v13 = vld [vmem:[%s1639_s2 + $0x20] sm:$0xff]  ;;  %v54_v14 = vld [vmem:[%s1639_s2 + $0x38] sm:$0xff]  ;;  %v52_v15 = vld [vmem:[%s1639_s2 + $0x28] sm:$0xff] }
   0x6   :  { %v50_v16 = vld [vmem:[%s1639_s2 + $0x18] sm:$0xff]  ;;  %v49_v17 = vld [vmem:[%s1639_s2 + $0x10] sm:$0xff]  ;;  %v47_v18 = vld [vmem:[%s1639_s2] sm:$0xff] }
   0x7   :  { %1052 = vmatmul.msk.bf16.vlgmr.msra.gmra.mxu0 %vm189_vm0, %v1220_v5  ;;  %v1222_v19 = vld [vmem:[%s1641_s1 + $0x10] sm:$0xff]  ;;  %v48_v21 = vld [vmem:[%s1639_s2 + $0x8] sm:$0xff]  ;;  %v318_v22 = vld [vmem:[%s1642_s4 + $0x78] sm:$0xff] }
   0x8   :  { %v317_v20 = vld [vmem:[%s1642_s4 + $0x70] sm:$0xff]  ;;  %v316_v23 = vld [vmem:[%s1642_s4 + $0x68] sm:$0xff]  ;;  %v315_v24 = vld [vmem:[%s1642_s4 + $0x60] sm:$0xff] }
   0x9   :  { %v313_v25 = vld [vmem:[%s1642_s4 + $0x50] sm:$0xff]  ;;  %v1223_v26 = vld [vmem:[%s1641_s1 + $0x18] sm:$0xff]  ;;  %v311_v27 = vld [vmem:[%s1642_s4 + $0x40] sm:$0xff] }
   0xa   :  { %130 = vperm.xlu1 %1255, %v60_v6   ;;  %v314_v28 = vld [vmem:[%s1642_s4 + $0x58] sm:$0xff]  ;;  %v312_v29 = vld [vmem:[%s1642_s4 + $0x48] sm:$0xff]  ;;  %v309_v31 = vld [vmem:[%s1642_s4 + $0x30] sm:$0xff] }
   0xb   :  { %140 = vperm.xlu0 %1254, %v62_v7   ;;  %120 = vperm.xlu2 %1256, %v58_v8   ;;  %v310_v30 = vld [vmem:[%s1642_s4 + $0x38] sm:$0xff]  ;;  %v307_v32 = vld [vmem:[%s1642_s4 + $0x20] sm:$0xff]  ;;  %v305_v34 = vld [vmem:[%s1642_s4 + $0x10] sm:$0xff] }
   0xc   :  { %v1224_v33 = vld [vmem:[%s1641_s1 + $0x20] sm:$0xff]  ;;  %v308_v35 = vld [vmem:[%s1642_s4 + $0x28] sm:$0xff]  ;;  %v306_v36 = vld [vmem:[%s1642_s4 + $0x18] sm:$0xff] }
   0xd   :  { %v304_v37 = vld [vmem:[%s1642_s4 + $0x8] sm:$0xff]  ;;  %v303_v38 = vld [vmem:[%s1642_s4] sm:$0xff]  ;;  %v1122_v39 = vld [vmem:[%s1642_s4 + $0xf0] sm:$0xff] }
   0xe   :  { %v1225_v40 = vld [vmem:[%s1641_s1 + $0x28] sm:$0xff]  ;;  %v1120_v41 = vld [vmem:[%s1642_s4 + $0xe0] sm:$0xff]  ;;  %v1123_v42 = vld [vmem:[%s1642_s4 + $0xf8] sm:$0xff] }
   0xf   :  { %v1121_v43 = vld [vmem:[%s1642_s4 + $0xe8] sm:$0xff]  ;;  %v1119_v44 = vld [vmem:[%s1642_s4 + $0xd8] sm:$0xff]  ;;  %v1118_v45 = vld [vmem:[%s1642_s4 + $0xd0] sm:$0xff] }
  0x10   :  { %v1116_v46 = vld [vmem:[%s1642_s4 + $0xc0] sm:$0xff]  ;;  %v1226_v47 = vld [vmem:[%s1641_s1 + $0x30] sm:$0xff]  ;;  %v1117_v49 = vld [vmem:[%s1642_s4 + $0xc8] sm:$0xff] }
  0x11   :  { %v1114_v48 = vld [vmem:[%s1642_s4 + $0xb0] sm:$0xff]  ;;  %v1115_v50 = vld [vmem:[%s1642_s4 + $0xb8] sm:$0xff]  ;;  %v1113_v51 = vld [vmem:[%s1642_s4 + $0xa8] sm:$0xff] }
  0x12   :  { %110 = vperm.xlu1 %1255, %v56_v9   ;;  %v1112_v52 = vld [vmem:[%s1642_s4 + $0xa0] sm:$0xff]  ;;  %v1110_v53 = vld [vmem:[%s1642_s4 + $0x90] sm:$0xff]  ;;  %v1227_v55 = vld [vmem:[%s1641_s1 + $0x38] sm:$0xff] }
  0x13   :  { %105 = vperm.xlu0 %1254, %v55_v10   ;;  %95 = vperm.xlu2 %1256, %v53_v11   ;;  %v1108_v58 = vld [vmem:[%s1642_s4 + $0x80] sm:$0xff]  ;;  %v1111_v59 = vld [vmem:[%s1642_s4 + $0x98] sm:$0xff]  ;;  %v1109_v60 = vld [vmem:[%s1642_s4 + $0x88] sm:$0xff] }
  0x14   :  { %v1187_v0 = vld [vmem:[%s1642_s4 + $0x178] sm:$0xff]  ;;  %v1186_v1 = vld [vmem:[%s1642_s4 + $0x170] sm:$0xff]  ;;  %v1184_v2 = vld [vmem:[%s1642_s4 + $0x160] sm:$0xff] }
  0x15   :  { %v1182_v7 = vld [vmem:[%s1642_s4 + $0x150] sm:$0xff]  ;;  %v1185_v9 = vld [vmem:[%s1642_s4 + $0x168] sm:$0xff]  ;;  %v1183_v10 = vld [vmem:[%s1642_s4 + $0x158] sm:$0xff] }
  0x17   :  { %1053 = vmatmul.msk.bf16.gmra.mxu0 %vm189_vm0, %v1221_v12 }
  0x1a   :  { %85 = vperm.xlu1 %1255, %v51_v13   ;;  %v1181_v13 = vld [vmem:[%s1642_s4 + $0x148] sm:$0xff] }
  0x1b   :  { %100 = vperm.xlu0 %1254, %v54_v14   ;;  %90 = vperm.xlu2 %1256, %v52_v15   ;;  %v1180_v14 = vld [vmem:[%s1642_s4 + $0x140] sm:$0xff]  ;;  %v1178_v15 = vld [vmem:[%s1642_s4 + $0x130] sm:$0xff] }
  0x22   :  { %80 = vperm.xlu1 %1255, %v50_v16  }
  0x23   :  { %75 = vperm.xlu0 %1254, %v49_v17   ;;  %65 = vperm.xlu2 %1256, %v47_v18  }
  0x27   :  { %1054 = vmatmul.msk.bf16.gmra.mxu0 %vm189_vm0, %v1222_v19 }
  0x2a   :  { %391 = vperm.xlu1 %1255, %v317_v20   ;;  %v1176_v20 = vld [vmem:[%s1642_s4 + $0x120] sm:$0xff] }
  0x2b   :  { %70 = vperm.xlu0 %1254, %v48_v21   ;;  %396 = vperm.xlu2 %1256, %v318_v22   ;;  %v1179_v21 = vld [vmem:[%s1642_s4 + $0x138] sm:$0xff]  ;;  %v1177_v22 = vld [vmem:[%s1642_s4 + $0x128] sm:$0xff] }
  0x32   :  { %386 = vperm.xlu1 %1255, %v316_v23  }
  0x33   :  { %381 = vperm.xlu0 %1254, %v315_v24   ;;  %371 = vperm.xlu2 %1256, %v313_v25  }
  0x37   :  { %1055 = vmatmul.msk.bf16.gmra.mxu0 %vm189_vm0, %v1223_v26 }
  0x3a   :  { %361 = vperm.xlu1 %1255, %v311_v27  }
  0x3b   :  { %376 = vperm.xlu0 %1254, %v314_v28   ;;  %366 = vperm.xlu2 %1256, %v312_v29  }
  0x42   :  { %356 = vperm.xlu1 %1255, %v310_v30  }
  0x43   :  { %351 = vperm.xlu0 %1254, %v309_v31   ;;  %341 = vperm.xlu2 %1256, %v307_v32  }
  0x47   :  { %1056 = vmatmul.msk.bf16.gmra.mxu0 %vm189_vm0, %v1224_v33  ;;  %v1175_v33 = vld [vmem:[%s1642_s4 + $0x118] sm:$0xff] }
  0x4a   :  { %331 = vperm.xlu1 %1255, %v305_v34  }
  0x4b   :  { %346 = vperm.xlu0 %1254, %v308_v35   ;;  %336 = vperm.xlu2 %1256, %v306_v36   ;;  %v1174_v36 = vld [vmem:[%s1642_s4 + $0x110] sm:$0xff] }
  0x52   :  { %326 = vperm.xlu1 %1255, %v304_v37   ;;  %v1172_v37 = vld [vmem:[%s1642_s4 + $0x100] sm:$0xff] }
  0x53   :  { %321 = vperm.xlu0 %1254, %v303_v38   ;;  %626 = vperm.xlu2 %1256, %v1122_v39  }
  0x57   :  { %1057 = vmatmul.msk.bf16.gmra.mxu0 %vm189_vm0, %v1225_v40 }
  0x5a   :  { %616 = vperm.xlu1 %1255, %v1120_v41   ;;  %v991_v41 = vld [vmem:[#allocation2] sm:$0x1] }
  0x5b   :  { %631 = vperm.xlu0 %1254, %v1123_v42   ;;  %621 = vperm.xlu2 %1256, %v1121_v43   ;;  %v1173_v42 = vld [vmem:[%s1642_s4 + $0x108] sm:$0xff] }
  0x5d   :  { %v1464_v54 = vpop.permute.xlu2 %115 }
  0x62   :  { %611 = vperm.xlu1 %1255, %v1119_v44  }
  0x63   :  { %606 = vperm.xlu0 %1254, %v1118_v45   ;;  %596 = vperm.xlu2 %1256, %v1116_v46  }
  0x65   :  { %v1483_v61 = vpop.permute.xlu2 %120 }
  0x67   :  { %1058 = vmatmul.msk.bf16.gmra.mxu0 %vm189_vm0, %v1226_v47 }
  0x6a   :  { %586 = vperm.xlu1 %1255, %v1114_v48  }
  0x6b   :  { %601 = vperm.xlu0 %1254, %v1117_v49   ;;  %591 = vperm.xlu2 %1256, %v1115_v50  }
  0x6d   :  { %v96_v6 = vpop.permute.xlu2 %95 }
  0x72   :  { %581 = vperm.xlu1 %1255, %v1113_v51  }
  0x73   :  { %576 = vperm.xlu0 %1254, %v1112_v52   ;;  %566 = vperm.xlu2 %1256, %v1110_v53  }
  0x74   :  { %v1469_v56 = vpop.permute.xlu1 %125 }
  0x75   :  { %v1471_v57 = vpop.permute.xlu0 %135  ;;  %v91_v16 = vpop.permute.xlu2 %90 }
  0x77   :  { %1059 = vmatmul.msk.bf16.gmra.mxu0 %vm189_vm0, %v1227_v55 }
  0x7a   :  { %556 = vperm.xlu1 %1255, %v1108_v58  }
  0x7b   :  { %571 = vperm.xlu0 %1254, %v1111_v59   ;;  %561 = vperm.xlu2 %1256, %v1109_v60  }
  0x7c   :  { %v1487_v63 = vpop.permute.xlu1 %130 }
  0x7d   :  { %v1485_v62 = vpop.permute.xlu0 %140  ;;  %v66_v23 = vpop.permute.xlu2 %65 }
  0x82   :  { %866 = vperm.xlu1 %1255, %v1187_v0  }
  0x83   :  { %861 = vperm.xlu0 %1254, %v1186_v1   ;;  %851 = vperm.xlu2 %1256, %v1184_v2  }
  0x84   :  { %v223_v4 = vpop.f32.mrf.mxu0  ;;  %v1506_v8 = vpop.permute.xlu1 %110 }
  0x85   :  { %v1501_v5 = vpop.permute.xlu0 %105  ;;  %v224_v25 = vadd.f32 %v223_v4, %v66_v23 }
  0x87   :  { %v263_v34 = vmax.f32 %v224_v25, 0.0  ;;  %v1234_v25 = vld [vmem:[%s1644_s3 + $0x28] sm:$0xff] }
  0x8a   :  { %841 = vperm.xlu1 %1255, %v1182_v7  }
  0x8b   :  { %856 = vperm.xlu0 %1254, %v1185_v9   ;;  %846 = vperm.xlu2 %1256, %v1183_v10  }
  0x8c   :  { %v225_v11 = vpop.f32.mrf.mxu0  ;;  %v86_v17 = vpop.permute.xlu1 %85 }
  0x8d   :  { %v101_v12 = vpop.permute.xlu0 %100 }
  0x92   :  { %836 = vperm.xlu1 %1255, %v1181_v13  }
  0x93   :  { %831 = vperm.xlu0 %1254, %v1180_v14   ;;  %821 = vperm.xlu2 %1256, %v1178_v15  }
  0x94   :  { %v228_v18 = vpop.f32.mrf.mxu0  ;;  %v81_v26 = vpop.permute.xlu1 %80 }
  0x95   :  { %v76_v19 = vpop.permute.xlu0 %75 }
  0x96   :  { %v229_v24 = vadd.f32 %v228_v18, %v76_v19 }
  0x98   :  { %v265_v31 = vmax.f32 %v229_v24, 0.0  ;;  %v1233_v24 = vld [vmem:[%s1644_s3 + $0x20] sm:$0xff] }
  0x9a   :  { %811 = vperm.xlu1 %1255, %v1176_v20  }
  0x9b   :  { %826 = vperm.xlu0 %1254, %v1179_v21   ;;  %816 = vperm.xlu2 %1256, %v1177_v22  }
  0x9c   :  { %v230_v27 = vpop.f32.mrf.mxu0 }
  0x9d   :  { %v71_v28 = vpop.permute.xlu0 %70  ;;  %v231_v29 = vadd.f32 %v230_v27, %v81_v26  ;;  %v392_v26 = vpop.permute.xlu1 %391 }
  0x9e   :  { %v226_v30 = vadd.f32 %v225_v11, %v71_v28  ;;  %v1235_v28 = vld [vmem:[%s1644_s3 + $0x30] sm:$0xff] }
  0x9f   :  { %v266_v32 = vmax.f32 %v231_v29, 0.0 }
  0xa0   :  { %v264_v35 = vmax.f32 %v226_v30, 0.0 }
  0xa1   :  { %v296_v38 = vpack.c.bf16 %v266_v32, %v265_v31  ;;  %v1236_v32 = vld [vmem:[%s1644_s3 + $0x38] sm:$0xff] }
  0xa2   :  { %806 = vperm.xlu1 %1255, %v1175_v33   ;;  %v295_v39 = vpack.c.bf16 %v264_v35, %v263_v34  ;;  %v397_v33 = vpop.permute.xlu2 %396 }
  0xa3   :  { %801 = vperm.xlu0 %1254, %v1174_v36   ;;  %791 = vperm.xlu2 %1256, %v1172_v37  }
  0xa4   :  { %v233_v40 = vpop.f32.mrf.mxu0 }
  0xa5   :  { %v234_v43 = vadd.f32 %v233_v40, %v86_v17  ;;  %v382_v27 = vpop.permute.xlu0 %381  ;;  %v387_v29 = vpop.permute.xlu1 %386 }
  0xa7   :  { %v267_v46 = vmax.f32 %v234_v43, 0.0 }
  0xaa   :  { %994 = vperm.xlu1 %1255, %v991_v41   ;;  %v372_v36 = vpop.permute.xlu2 %371 }
  0xab   :  { %796 = vperm.xlu0 %1254, %v1173_v42  }
  0xac   :  { %v235_v44 = vpop.f32.mrf.mxu0 }
  0xad   :  { %v236_v45 = vadd.f32 %v235_v44, %v91_v16  ;;  %v377_v30 = vpop.permute.xlu0 %376  ;;  %v1573_v31 = vpop.permute.xlu1 %361 }
  0xaf   :  { %v268_v47 = vmax.f32 %v236_v45, 0.0 }
  0xb1   :  { %v297_v48 = vpack.c.bf16 %v268_v47, %v267_v46 }
  0xb2   :  { %v367_v40 = vpop.permute.xlu2 %366 }
  0xb4   :  { %v238_v49 = vpop.f32.mrf.mxu0 }
  0xb5   :  { %v239_v50 = vadd.f32 %v238_v49, %v96_v6  ;;  %v352_v34 = vpop.permute.xlu0 %351  ;;  %v357_v35 = vpop.permute.xlu1 %356 }
  0xb7   :  { %v269_v53 = vmax.f32 %v239_v50, 0.0 }
  0xba   :  { %v342_v49 = vpop.permute.xlu2 %341 }
  0xbc   :  { %v240_v51 = vpop.f32.mrf.mxu0 }
  0xbd   :  { %v241_v52 = vadd.f32 %v240_v51, %v101_v12  ;;  %v347_v37 = vpop.permute.xlu0 %346 }
  0xbf   :  { %v270_v55 = vmax.f32 %v241_v52, 0.0 }
  0xc1   :  { %v298_v58 = vpack.c.bf16 %v270_v55, %v269_v53 }
  0xc2   :  { %v337_v52 = vpop.permute.xlu2 %336 }
  0xc4   :  { %v243_v59 = vpop.f32.mrf.mxu0 }
  0xc5   :  { %v322_v41 = vpop.permute.xlu0 %321 }
  0xcc   :  { %v245_v60 = vpop.f32.mrf.mxu0 }
  0xcd   :  { %v246_v19 = vadd.f32 %v245_v60, %v1506_v8  ;;  %v1232_v8 = vld [vmem:[%s1644_s3 + $0x18] sm:$0xff] }
  0xd4   :  { %v248_v0 = vpop.f32.mrf.mxu0 }
  0xd5   :  { %v249_v17 = vadd.f32 %v248_v0, %v1464_v54  ;;  %v1229_v54 = vld [vmem:[%s1644_s3] sm:$0xff] }
  0xd7   :  { %v273_v21 = vmax.f32 %v249_v17, 0.0 }
  0xdc   :  { %v250_v1 = vpop.f32.mrf.mxu0 }
  0xdd   :  { %v251_v14 = vadd.f32 %v250_v1, %v1483_v61  ;;  %v1230_v61 = vld [vmem:[%s1644_s3 + $0x8] sm:$0xff] }
  0xe4   :  { %v253_v2 = vpop.f32.mrf.mxu0 }
  0xe5   :  { %v254_v6 = vadd.f32 %v253_v2, %v1469_v56 }
  0xe7   :  { %v275_v18 = vmax.f32 %v254_v6, 0.0 }
  0xec   :  { %v255_v3 = vpop.f32.mrf.mxu0 }
  0xed   :  { %v256_v10 = vadd.f32 %v255_v3, %v1487_v63  ;;  %v244_v63 = vadd.f32 %v243_v59, %v1501_v5  ;;  %v1231_v5 = vld [vmem:[%s1644_s3 + $0x10] sm:$0xff] }
  0xef   :  { %v276_v15 = vmax.f32 %v256_v10, 0.0  ;;  %v271_v22 = vmax.f32 %v244_v63, 0.0 }
  0xf1   :  { %v301_v20 = vpack.c.bf16 %v276_v15, %v275_v18 }
  0xf4   :  { %v258_v4 = vpop.f32.mrf.mxu0 }
  0xf5   :  { %v259_v7 = vadd.f32 %v258_v4, %v1471_v57  ;;  %v274_v57 = vmax.f32 %v251_v14, 0.0 }
  0xf7   :  { %v277_v12 = vmax.f32 %v259_v7, 0.0  ;;  %v300_v56 = vpack.c.bf16 %v274_v57, %v273_v21 }
  0xfc   :  { %v260_v9 = vpop.f32.mrf.mxu0 }
  0xfd   :  { %v261_v11 = vadd.f32 %v260_v9, %v1485_v62  ;;  %v272_v62 = vmax.f32 %v246_v19, 0.0 }
  0xff   :  { %v278_v13 = vmax.f32 %v261_v11, 0.0  ;;  %v299_v23 = vpack.c.bf16 %v272_v62, %v271_v22 }
 0x101   :  { %v302_v16 = vpack.c.bf16 %v278_v13, %v277_v12 }
 0x103   :  { %447 = vmatpush.bf16.msra.mxu1 %v302_v16 }
 0x107   :  { %448 = vmatpush.bf16.msra.mxu1 %v301_v20 }
 0x10b   :  { %449 = vmatpush.bf16.msra.mxu1 %v300_v56 }
 0x10f   :  { %450 = vmatpush.bf16.msra.mxu1 %v299_v23 }
 0x113   :  { %451 = vmatpush.bf16.msra.mxu1 %v298_v58 }
 0x117   :  { %452 = vmatpush.bf16.msra.mxu1 %v297_v48 }
 0x11b   :  { %453 = vmatpush.bf16.msra.mxu1 %v296_v38  ;;  %v332_v38 = vpop.permute.xlu1 %331 }
 0x11f   :  { %454 = vmatpush.bf16.msra.mxu1 %v295_v39 }
 0x122   :  { %455 = vmatmul.bf16.vlgmr.msra.gmra.mxu1 %v1229_v54 }
 0x123   :  { %v327_v43 = vpop.permute.xlu1 %326 }
 0x132   :  { %460 = vmatmul.bf16.gmra.mxu1 %v1230_v61 }
 0x142   :  { %465 = vmatmul.bf16.gmra.mxu1 %v1231_v5 }
 0x152   :  { %470 = vmatmul.bf16.gmra.mxu1 %v1232_v8 }
 0x162   :  { %475 = vmatmul.bf16.gmra.mxu1 %v1233_v24 }
 0x172   :  { %480 = vmatmul.bf16.gmra.mxu1 %v1234_v25 }
 0x182   :  { %485 = vmatmul.bf16.gmra.mxu1 %v1235_v28 }
 0x192   :  { %490 = vmatmul.bf16.gmra.mxu1 %v1236_v32 }
 0x19f   :  { %v456_v39 = vpop.f32.mrf.mxu1 }
 0x1a0   :  { %v457_v42 = vadd.f32 %v456_v39, %v322_v41  ;;  %v1242_v41 = vld [vmem:[%s1644_s3 + $0x68] sm:$0xff] }
 0x1a2   :  { %v496_v46 = vmax.f32 %v457_v42, 0.0  ;;  %v627_v42 = vpop.permute.xlu2 %626 }
 0x1a7   :  { %v458_v44 = vpop.f32.mrf.mxu1 }
 0x1a8   :  { %v459_v45 = vadd.f32 %v458_v44, %v327_v43  ;;  %v1243_v43 = vld [vmem:[%s1644_s3 + $0x70] sm:$0xff]  ;;  %v617_v44 = vpop.permute.xlu1 %616 }
 0x1aa   :  { %v497_v47 = vmax.f32 %v459_v45, 0.0  ;;  %v622_v45 = vpop.permute.xlu2 %621 }
 0x1ac   :  { %v529_v48 = vpack.c.bf16 %v497_v47, %v496_v46  ;;  %v1244_v47 = vld [vmem:[%s1644_s3 + $0x78] sm:$0xff] }
 0x1af   :  { %v461_v50 = vpop.f32.mrf.mxu1 }
 0x1b0   :  { %v462_v51 = vadd.f32 %v461_v50, %v332_v38  ;;  %v612_v46 = vpop.permute.xlu1 %611 }
 0x1b2   :  { %v498_v58 = vmax.f32 %v462_v51, 0.0 }
 0x1b7   :  { %v463_v53 = vpop.f32.mrf.mxu1 }
 0x1b8   :  { %v464_v55 = vadd.f32 %v463_v53, %v337_v52  ;;  %v587_v50 = vpop.permute.xlu1 %586 }
 0x1ba   :  { %v499_v59 = vmax.f32 %v464_v55, 0.0 }
 0x1bc   :  { %v530_v60 = vpack.c.bf16 %v499_v59, %v498_v58 }
 0x1bf   :  { %v466_v0 = vpop.f32.mrf.mxu1 }
 0x1c0   :  { %v467_v1 = vadd.f32 %v466_v0, %v342_v49  ;;  %v632_v49 = vpop.permute.xlu0 %631  ;;  %v582_v53 = vpop.permute.xlu1 %581 }
 0x1c2   :  { %v500_v4 = vmax.f32 %v467_v1, 0.0 }
 0x1c7   :  { %v468_v2 = vpop.f32.mrf.mxu1 }
 0x1c8   :  { %v469_v3 = vadd.f32 %v468_v2, %v347_v37  ;;  %v607_v52 = vpop.permute.xlu0 %606 }
 0x1ca   :  { %v501_v7 = vmax.f32 %v469_v3, 0.0 }
 0x1cc   :  { %v531_v9 = vpack.c.bf16 %v501_v7, %v500_v4 }
 0x1cf   :  { %v471_v10 = vpop.f32.mrf.mxu1 }
 0x1d0   :  { %v472_v11 = vadd.f32 %v471_v10, %v352_v34  ;;  %v602_v59 = vpop.permute.xlu0 %601 }
 0x1d2   :  { %v502_v13 = vmax.f32 %v472_v11, 0.0 }
 0x1d7   :  { %v473_v6 = vpop.f32.mrf.mxu1 }
 0x1d8   :  { %v474_v12 = vadd.f32 %v473_v6, %v357_v35  ;;  %v577_v10 = vpop.permute.xlu0 %576 }
 0x1da   :  { %v503_v14 = vmax.f32 %v474_v12, 0.0 }
 0x1dc   :  { %v532_v15 = vpack.c.bf16 %v503_v14, %v502_v13 }
 0x1df   :  { %v476_v16 = vpop.f32.mrf.mxu1 }
 0x1e0   :  { %v477_v37 = vadd.f32 %v476_v16, %v1573_v31  ;;  %v1238_v31 = vld [vmem:[%s1644_s3 + $0x48] sm:$0xff]  ;;  %v572_v12 = vpop.permute.xlu0 %571 }
 0x1e7   :  { %v478_v17 = vpop.f32.mrf.mxu1 }
 0x1e8   :  { %v479_v32 = vadd.f32 %v478_v17, %v367_v40  ;;  %v1241_v40 = vld [vmem:[%s1644_s3 + $0x60] sm:$0xff] }
 0x1ef   :  { %v481_v18 = vpop.f32.mrf.mxu1 }
 0x1f0   :  { %v482_v25 = vadd.f32 %v481_v18, %v372_v36  ;;  %v1240_v36 = vld [vmem:[%s1644_s3 + $0x58] sm:$0xff] }
 0x1f2   :  { %v506_v38 = vmax.f32 %v482_v25, 0.0 }
 0x1f7   :  { %v483_v19 = vpop.f32.mrf.mxu1 }
 0x1f8   :  { %v484_v5 = vadd.f32 %v483_v19, %v377_v30  ;;  %v1237_v30 = vld [vmem:[%s1644_s3 + $0x40] sm:$0xff] }
 0x1fa   :  { %v507_v34 = vmax.f32 %v484_v5, 0.0 }
 0x1fc   :  { %v534_v39 = vpack.c.bf16 %v507_v34, %v506_v38 }
 0x1ff   :  { %v486_v57 = vpop.f32.mrf.mxu1 }
 0x200   :  { %v487_v23 = vadd.f32 %v486_v57, %v382_v27 }
 0x202   :  { %v508_v28 = vmax.f32 %v487_v23, 0.0 }
 0x207   :  { %v488_v20 = vpop.f32.mrf.mxu1 }
 0x208   :  { %v489_v56 = vadd.f32 %v488_v20, %v387_v29  ;;  %v504_v29 = vmax.f32 %v477_v37, 0.0 }
 0x20a   :  { %v509_v8 = vmax.f32 %v489_v56, 0.0 }
 0x20c   :  { %v535_v35 = vpack.c.bf16 %v509_v8, %v508_v28 }
 0x20f   :  { %v491_v63 = vpop.f32.mrf.mxu1 }
 0x210   :  { %v492_v21 = vadd.f32 %v491_v63, %v392_v26  ;;  %v505_v26 = vmax.f32 %v479_v32, 0.0 }
 0x212   :  { %v510_v54 = vmax.f32 %v492_v21, 0.0  ;;  %v533_v27 = vpack.c.bf16 %v505_v26, %v504_v29 }
 0x217   :  { %v493_v62 = vpop.f32.mrf.mxu1 }
 0x218   :  { %v494_v22 = vadd.f32 %v493_v62, %v397_v33  ;;  %v1239_v33 = vld [vmem:[%s1644_s3 + $0x50] sm:$0xff] }
 0x21a   :  { %v511_v61 = vmax.f32 %v494_v22, 0.0 }
 0x21c   :  { %v536_v24 = vpack.c.bf16 %v511_v61, %v510_v54 }
 0x21e   :  { %682 = vmatpush.bf16.msra.mxu2 %v536_v24 }
 0x222   :  { %683 = vmatpush.bf16.msra.mxu2 %v535_v35 }
 0x226   :  { %684 = vmatpush.bf16.msra.mxu2 %v534_v39 }
 0x22a   :  { %685 = vmatpush.bf16.msra.mxu2 %v533_v27 }
 0x22e   :  { %686 = vmatpush.bf16.msra.mxu2 %v532_v15 }
 0x232   :  { %687 = vmatpush.bf16.msra.mxu2 %v531_v9 }
 0x236   :  { %688 = vmatpush.bf16.msra.mxu2 %v530_v60  ;;  %v557_v60 = vpop.permute.xlu1 %556 }
 0x23a   :  { %689 = vmatpush.bf16.msra.mxu2 %v529_v48  ;;  %v1603_v48 = vpop.permute.xlu2 %596 }
 0x23d   :  { %690 = vmatmul.bf16.vlgmr.msra.gmra.mxu2 %v1237_v30 }
 0x242   :  { %v592_v51 = vpop.permute.xlu2 %591 }
 0x24a   :  { %v567_v55 = vpop.permute.xlu2 %566 }
 0x24d   :  { %695 = vmatmul.bf16.gmra.mxu2 %v1238_v31 }
 0x252   :  { %v562_v1 = vpop.permute.xlu2 %561 }
 0x25d   :  { %700 = vmatmul.bf16.gmra.mxu2 %v1239_v33 }
 0x26d   :  { %705 = vmatmul.bf16.gmra.mxu2 %v1240_v36 }
 0x27d   :  { %710 = vmatmul.bf16.gmra.mxu2 %v1241_v40 }
 0x28d   :  { %715 = vmatmul.bf16.gmra.mxu2 %v1242_v41 }
 0x29d   :  { %720 = vmatmul.bf16.gmra.mxu2 %v1243_v43 }
 0x2ad   :  { %725 = vmatmul.bf16.gmra.mxu2 %v1244_v47 }
 0x2c0   :  { %v691_v58 = vpop.f32.mrf.mxu2 }
 0x2c1   :  { %v692_v0 = vadd.f32 %v691_v58, %v557_v60  ;;  %v1250_v60 = vld [vmem:[%s1644_s3 + $0xa8] sm:$0xff] }
 0x2c3   :  { %v731_v4 = vmax.f32 %v692_v0, 0.0  ;;  %v862_v0 = vpop.permute.xlu0 %861 }
 0x2c8   :  { %v693_v2 = vpop.f32.mrf.mxu2 }
 0x2c9   :  { %v694_v3 = vadd.f32 %v693_v2, %v562_v1  ;;  %v1251_v1 = vld [vmem:[%s1644_s3 + $0xb0] sm:$0xff]  ;;  %v852_v2 = vpop.permute.xlu2 %851 }
 0x2cb   :  { %v732_v7 = vmax.f32 %v694_v3, 0.0  ;;  %v857_v3 = vpop.permute.xlu0 %856 }
 0x2cd   :  { %v764_v9 = vpack.c.bf16 %v732_v7, %v731_v4  ;;  %v1252_v7 = vld [vmem:[%s1644_s3 + $0xb8] sm:$0xff] }
 0x2d0   :  { %v696_v11 = vpop.f32.mrf.mxu2 }
 0x2d1   :  { %v697_v6 = vadd.f32 %v696_v11, %v567_v55  ;;  %v847_v4 = vpop.permute.xlu2 %846 }
 0x2d3   :  { %v733_v15 = vmax.f32 %v697_v6, 0.0 }
 0x2d8   :  { %v698_v13 = vpop.f32.mrf.mxu2 }
 0x2d9   :  { %v699_v14 = vadd.f32 %v698_v13, %v572_v12  ;;  %v822_v11 = vpop.permute.xlu2 %821 }
 0x2db   :  { %v734_v16 = vmax.f32 %v699_v14, 0.0 }
 0x2dd   :  { %v765_v17 = vpack.c.bf16 %v734_v16, %v733_v15 }
 0x2e0   :  { %v701_v18 = vpop.f32.mrf.mxu2 }
 0x2e1   :  { %v702_v19 = vadd.f32 %v701_v18, %v577_v10  ;;  %v867_v10 = vpop.permute.xlu1 %866  ;;  %v817_v13 = vpop.permute.xlu2 %816 }
 0x2e3   :  { %v735_v63 = vmax.f32 %v702_v19, 0.0 }
 0x2e8   :  { %v703_v57 = vpop.f32.mrf.mxu2 }
 0x2e9   :  { %v704_v20 = vadd.f32 %v703_v57, %v582_v53  ;;  %v842_v12 = vpop.permute.xlu1 %841 }
 0x2eb   :  { %v736_v21 = vmax.f32 %v704_v20, 0.0 }
 0x2ed   :  { %v766_v62 = vpack.c.bf16 %v736_v21, %v735_v63 }
 0x2f0   :  { %v706_v56 = vpop.f32.mrf.mxu2 }
 0x2f1   :  { %v707_v22 = vadd.f32 %v706_v56, %v587_v50  ;;  %v837_v16 = vpop.permute.xlu1 %836 }
 0x2f3   :  { %v737_v61 = vmax.f32 %v707_v22, 0.0 }
 0x2f8   :  { %v708_v23 = vpop.f32.mrf.mxu2 }
 0x2f9   :  { %v709_v54 = vadd.f32 %v708_v23, %v592_v51  ;;  %v812_v56 = vpop.permute.xlu1 %811 }
 0x2fb   :  { %v738_v5 = vmax.f32 %v709_v54, 0.0 }
 0x2fd   :  { %v767_v8 = vpack.c.bf16 %v738_v5, %v737_v61 }
 0x300   :  { %v711_v24 = vpop.f32.mrf.mxu2 }
 0x301   :  { %v712_v53 = vadd.f32 %v711_v24, %v1603_v48  ;;  %v1246_v48 = vld [vmem:[%s1644_s3 + $0x88] sm:$0xff]  ;;  %v807_v54 = vpop.permute.xlu1 %806 }
 0x308   :  { %v713_v25 = vpop.f32.mrf.mxu2 }
 0x309   :  { %v714_v47 = vadd.f32 %v713_v25, %v602_v59  ;;  %v1249_v59 = vld [vmem:[%s1644_s3 + $0xa0] sm:$0xff] }
 0x310   :  { %v716_v28 = vpop.f32.mrf.mxu2 }
 0x311   :  { %v717_v41 = vadd.f32 %v716_v28, %v607_v52  ;;  %v1248_v52 = vld [vmem:[%s1644_s3 + $0x98] sm:$0xff] }
 0x313   :  { %v741_v55 = vmax.f32 %v717_v41, 0.0 }
 0x318   :  { %v718_v32 = vpop.f32.mrf.mxu2 }
 0x319   :  { %v719_v33 = vadd.f32 %v718_v32, %v612_v46  ;;  %v1245_v46 = vld [vmem:[%s1644_s3 + $0x80] sm:$0xff] }
 0x31b   :  { %v742_v50 = vmax.f32 %v719_v33, 0.0 }
 0x31d   :  { %v769_v58 = vpack.c.bf16 %v742_v50, %v741_v55 }
 0x320   :  { %v721_v34 = vpop.f32.mrf.mxu2 }
 0x321   :  { %v722_v27 = vadd.f32 %v721_v34, %v617_v44 }
 0x323   :  { %v743_v43 = vmax.f32 %v722_v27, 0.0 }
 0x328   :  { %v723_v35 = vpop.f32.mrf.mxu2 }
 0x329   :  { %v724_v39 = vadd.f32 %v723_v35, %v622_v45  ;;  %v739_v45 = vmax.f32 %v712_v53, 0.0 }
 0x32b   :  { %v744_v36 = vmax.f32 %v724_v39, 0.0 }
 0x32d   :  { %v770_v51 = vpack.c.bf16 %v744_v36, %v743_v43 }
 0x330   :  { %v726_v37 = vpop.f32.mrf.mxu2 }
 0x331   :  { %v727_v38 = vadd.f32 %v726_v37, %v627_v42  ;;  %v740_v42 = vmax.f32 %v714_v47, 0.0 }
 0x333   :  { %v745_v30 = vmax.f32 %v727_v38, 0.0  ;;  %v768_v44 = vpack.c.bf16 %v740_v42, %v739_v45 }
 0x338   :  { %v728_v26 = vpop.f32.mrf.mxu2 }
 0x339   :  { %v729_v29 = vadd.f32 %v728_v26, %v632_v49  ;;  %v1247_v49 = vld [vmem:[%s1644_s3 + $0x90] sm:$0xff] }
 0x33b   :  { %v746_v31 = vmax.f32 %v729_v29, 0.0 }
 0x33d   :  { %v771_v40 = vpack.c.bf16 %v746_v31, %v745_v30 }
 0x33f   :  { %917 = vmatpush.bf16.msra.mxu3 %v771_v40 }
 0x343   :  { %918 = vmatpush.bf16.msra.mxu3 %v770_v51 }
 0x347   :  { %919 = vmatpush.bf16.msra.mxu3 %v769_v58 }
 0x34b   :  { %920 = vmatpush.bf16.msra.mxu3 %v768_v44 }
 0x34f   :  { %921 = vmatpush.bf16.msra.mxu3 %v767_v8 }
 0x353   :  { %922 = vmatpush.bf16.msra.mxu3 %v766_v62 }
 0x357   :  { %923 = vmatpush.bf16.msra.mxu3 %v765_v17  ;;  %v792_v17 = vpop.permute.xlu2 %791 }
 0x35b   :  { %924 = vmatpush.bf16.msra.mxu3 %v764_v9  ;;  %v1630_v9 = vpop.permute.xlu0 %831 }
 0x35e   :  { %925 = vmatmul.bf16.vlgmr.msra.gmra.mxu3 %v1245_v46 }
 0x363   :  { %v827_v6 = vpop.permute.xlu0 %826 }
 0x36b   :  { %v802_v14 = vpop.permute.xlu0 %801 }
 0x36e   :  { %930 = vmatmul.bf16.gmra.mxu3 %v1246_v48 }
 0x373   :  { %v797_v19 = vpop.permute.xlu0 %796 }
 0x37e   :  { %935 = vmatmul.bf16.gmra.mxu3 %v1247_v49 }
 0x38e   :  { %940 = vmatmul.bf16.gmra.mxu3 %v1248_v52 }
 0x39e   :  { %945 = vmatmul.bf16.gmra.mxu3 %v1249_v59 }
 0x3ae   :  { %950 = vmatmul.bf16.gmra.mxu3 %v1250_v60 }
 0x3be   :  { %955 = vmatmul.bf16.gmra.mxu3 %v1251_v1 }
 0x3ce   :  { %960 = vmatmul.bf16.gmra.mxu3 %v1252_v7 }
 0x3e1   :  { %v926_v15 = vpop.f32.mrf.mxu3 }
 0x3e2   :  { %v927_v18 = vadd.f32 %v926_v15, %v792_v17 }
 0x3e4   :  { %v966_v63 = vmax.f32 %v927_v18, 0.0 }
 0x3e9   :  { %v928_v57 = vpop.f32.mrf.mxu3 }
 0x3ea   :  { %v929_v20 = vadd.f32 %v928_v57, %v797_v19 }
 0x3ec   :  { %v967_v21 = vmax.f32 %v929_v20, 0.0 }
 0x3ee   :  { %v983_v62 = vpack.c.bf16 %v967_v21, %v966_v63 }
 0x3f1   :  { %v931_v22 = vpop.f32.mrf.mxu3 }
 0x3f2   :  { %v932_v23 = vadd.f32 %v931_v22, %v802_v14 }
 0x3f4   :  { %v968_v8 = vmax.f32 %v932_v23, 0.0 }
 0x3f9   :  { %v933_v61 = vpop.f32.mrf.mxu3 }
 0x3fa   :  { %v934_v5 = vadd.f32 %v933_v61, %v807_v54 }
 0x3fc   :  { %v969_v24 = vmax.f32 %v934_v5, 0.0 }
 0x3fe   :  { %v984_v25 = vpack.c.bf16 %v969_v24, %v968_v8 }
 0x401   :  { %v936_v28 = vpop.f32.mrf.mxu3 }
 0x402   :  { %v937_v32 = vadd.f32 %v936_v28, %v812_v56 }
 0x404   :  { %v970_v37 = vmax.f32 %v937_v32, 0.0 }
 0x409   :  { %v938_v34 = vpop.f32.mrf.mxu3 }
 0x40a   :  { %v939_v35 = vadd.f32 %v938_v34, %v817_v13 }
 0x40c   :  { %v971_v38 = vmax.f32 %v939_v35, 0.0 }
 0x40e   :  { %v985_v26 = vpack.c.bf16 %v971_v38, %v970_v37 }
 0x411   :  { %v941_v39 = vpop.f32.mrf.mxu3 }
 0x412   :  { %v942_v29 = vadd.f32 %v941_v39, %v822_v11 }
 0x414   :  { %v972_v31 = vmax.f32 %v942_v29, 0.0 }
 0x419   :  { %v943_v27 = vpop.f32.mrf.mxu3 }
 0x41a   :  { %v944_v30 = vadd.f32 %v943_v27, %v827_v6 }
 0x41c   :  { %v973_v33 = vmax.f32 %v944_v30, 0.0 }
 0x41e   :  { %v986_v36 = vpack.c.bf16 %v973_v33, %v972_v31 }
 0x421   :  { %v946_v40 = vpop.f32.mrf.mxu3 }
 0x422   :  { %v947_v13 = vadd.f32 %v946_v40, %v1630_v9 }
 0x429   :  { %v948_v41 = vpop.f32.mrf.mxu3 }
 0x42a   :  { %v949_v7 = vadd.f32 %v948_v41, %v837_v16 }
 0x431   :  { %v951_v43 = vpop.f32.mrf.mxu3 }
 0x432   :  { %v952_v60 = vadd.f32 %v951_v43, %v842_v12 }
 0x434   :  { %v976_v14 = vmax.f32 %v952_v60, 0.0 }
 0x439   :  { %v953_v47 = vpop.f32.mrf.mxu3 }
 0x43a   :  { %v954_v49 = vadd.f32 %v953_v47, %v847_v4  ;;  %v982_v4 = vld [vmem:[%s1645_s5] sm:$0x1] }
 0x43c   :  { %v977_v11 = vmax.f32 %v954_v49, 0.0 }
 0x43e   :  { %v988_v15 = vpack.c.bf16 %v977_v11, %v976_v14 }
 0x441   :  { %v956_v50 = vpop.f32.mrf.mxu3 }
 0x442   :  { %v957_v44 = vadd.f32 %v956_v50, %v852_v2 }
 0x444   :  { %v978_v1 = vmax.f32 %v957_v44, 0.0 }
 0x449   :  { %v958_v51 = vpop.f32.mrf.mxu3 }
 0x44a   :  { %v959_v58 = vadd.f32 %v958_v51, %v857_v3  ;;  %v974_v3 = vmax.f32 %v947_v13, 0.0 }
 0x44c   :  { %v979_v52 = vmax.f32 %v959_v58, 0.0 }
 0x44e   :  { %v989_v6 = vpack.c.bf16 %v979_v52, %v978_v1 }
 0x451   :  { %v961_v53 = vpop.f32.mrf.mxu3 }
 0x452   :  { %v962_v55 = vadd.f32 %v961_v53, %v862_v0  ;;  %v975_v0 = vmax.f32 %v949_v7, 0.0 }
 0x454   :  { %v980_v46 = vmax.f32 %v962_v55, 0.0  ;;  %v987_v2 = vpack.c.bf16 %v975_v0, %v974_v3 }
 0x459   :  { %v963_v42 = vpop.f32.mrf.mxu3 }
 0x45a   :  { %v964_v45 = vadd.f32 %v963_v42, %v867_v10  ;;  %v995_v10 = vpop.permute.xlu1 %994 }
 0x45b   :  { %v997_v12 = vperm.slane %v995_v10, 0 }
 0x45c   :  { %v981_v48 = vmax.f32 %v964_v45, 0.0 }
 0x45e   :  { %v990_v59 = vpack.c.bf16 %v981_v48, %v980_v46 }
 0x460   :  { %998 = vmatpush.bf16.msrb.mxu0 %v990_v59 }
 0x464   :  { %999 = vmatpush.bf16.msrb.mxu0 %v989_v6 }
 0x468   :  { %1000 = vmatpush.bf16.msrb.mxu0 %v988_v15 }
 0x46c   :  { %1001 = vmatpush.bf16.msrb.mxu0 %v987_v2 }
 0x470   :  { %1002 = vmatpush.bf16.msrb.mxu0 %v986_v36 }
 0x474   :  { %1003 = vmatpush.bf16.msrb.mxu0 %v985_v26 }
 0x478   :  { %1004 = vmatpush.bf16.msrb.mxu0 %v984_v25 }
 0x47c   :  { %1005 = vmatpush.bf16.msrb.mxu0 %v983_v62 }
 0x47f   :  { %1006 = vmatmul.bf16.vlgmr.msrb.gmra.mxu0 %v982_v4 }
 0x4fc   :  { %v1007_v9 = vpop.f32.mrf.mxu0 }
 0x4fd   :  { %v1008_v16 = vadd.f32 %v1007_v9, %v997_v12 }
 0x4ff   :  { %1011 = vst [vmem:[%s1646_s7] sm:$0x1] %v1008_v16 }
 0x504   :  { %v1009_v17 = vpop.f32.mrf.mxu0 }

</bundles_post_ra>
